<compile_context>
chip_gen: v5e
topology: v5e:2x2
jax: 0.10.0
libtpu: 0.0.40
codegen_flags: <defaults>
</compile_context>

<pallas_src>
import functools

import jax
import jax.numpy as jnp
from jax.experimental import pallas as pl
from jax.experimental.pallas import tpu as pltpu


# ---------------------------------------------------------------------------
# Layer sizes and packed-parameter layout (flat f32 vector in SMEM).
# ---------------------------------------------------------------------------
_D_IN, _H1, _H2, _D_OUT = 8, 6, 4, 1

_W1_OFF = 0                              # W1: (8, 6), row-major -> k * 6 + j
_B1_OFF = _W1_OFF + _D_IN * _H1          # 48
_W2_OFF = _B1_OFF + _H1                  # 54   W2: (6, 4) -> k * 4 + j
_B2_OFF = _W2_OFF + _H1 * _H2            # 78
_W3_OFF = _B2_OFF + _H2                  # 82   W3: (4, 1) -> k
_B3_OFF = _W3_OFF + _H2 * _D_OUT         # 86
_N_PARAMS = _B3_OFF + _D_OUT             # 87


def _round_up(n, m):
    return ((n + m - 1) // m) * m


def _sigmoid(z):
    # EUP-friendly sigmoid: tanh uses its own VLIW slot, VPU epilogue is cheap.
    return 0.5 * (jnp.tanh(0.5 * z) + 1.0)


# ---------------------------------------------------------------------------
# Kernel: whole 3-layer MLP on one (8, TILE) batch tile, batch on lanes.
# ---------------------------------------------------------------------------
def _mlp_kernel(p_ref, x_ref, o_ref):
    x = x_ref[...]                                   # (8, TILE) f32
    rows = [x[k:k + 1, :] for k in range(_D_IN)]     # 8 x (1, TILE)

    def layer(in_rows, n_in, n_out, w_off, b_off):
        out_rows = []
        for j in range(n_out):
            # Unrolled VPU multiply-accumulate of scalar-scaled vregs (no MXU).
            acc = in_rows[0] * p_ref[w_off + 0 * n_out + j]
            for k in range(1, n_in):
                acc = acc + in_rows[k] * p_ref[w_off + k * n_out + j]
            acc = acc + p_ref[b_off + j]
            out_rows.append(_sigmoid(acc))
        return out_rows

    h1 = layer(rows, _D_IN, _H1, _W1_OFF, _B1_OFF)   # 6 x (1, TILE)
    h2 = layer(h1, _H1, _H2, _W2_OFF, _B2_OFF)       # 4 x (1, TILE)
    y = layer(h2, _H2, _D_OUT, _W3_OFF, _B3_OFF)     # 1 x (1, TILE)

    o_ref[...] = y[0]                                # lane-dense (1, TILE) store


# ---------------------------------------------------------------------------
# Host wrapper: pack params once, transpose batch onto lanes, tile the batch.
# ---------------------------------------------------------------------------
def pack_params(w1, b1, w2, b2, w3, b3):
    """Pack all weights/biases into one flat f32 vector (SMEM operand)."""
    return jnp.concatenate([
        w1.reshape(-1).astype(jnp.float32),   # (8,6) row-major
        b1.reshape(-1).astype(jnp.float32),   # (6,)
        w2.reshape(-1).astype(jnp.float32),   # (6,4) row-major
        b2.reshape(-1).astype(jnp.float32),   # (4,)
        w3.reshape(-1).astype(jnp.float32),   # (4,1)
        b3.reshape(-1).astype(jnp.float32),   # (1,)
    ])


@functools.partial(jax.jit, static_argnames=("tile",))
def mlp_forward(x, params, *, tile=512):
    """x: (N, 8) f32, params: flat (87,) f32.  Returns (N, 1) f32."""
    n = x.shape[0]
    xt = x.astype(jnp.float32).T                     # (8, N): batch -> lanes

    tile_eff = min(tile, _round_up(n, 128))          # lane tile, multiple of 128
    n_pad = _round_up(n, tile_eff)
    if n_pad != n:
        xt = jnp.pad(xt, ((0, 0), (0, n_pad - n)))
    grid = (n_pad // tile_eff,)

    yt = pl.pallas_call(
        _mlp_kernel,
        out_shape=jax.ShapeDtypeStruct((1, n_pad), jnp.float32),
        grid=grid,
        in_specs=[
            # All weights/biases: one tiny operand, resident in SMEM.
            pl.BlockSpec(memory_space=pltpu.MemorySpace.SMEM),
            # Input tile: (8, TILE), batch on lanes, pipelined over the grid.
            pl.BlockSpec((_D_IN, tile_eff), lambda i: (0, i)),
        ],
        out_specs=pl.BlockSpec((_D_OUT, tile_eff), lambda i: (0, i)),
        compiler_params=pltpu.CompilerParams(
            dimension_semantics=("parallel",),       # shard batch tiles on v7x
        ),
        cost_estimate=pl.CostEstimate(
            flops=2 * n_pad * (_D_IN * _H1 + _H1 * _H2 + _H2 * _D_OUT),
            transcendentals=n_pad * (_H1 + _H2 + _D_OUT),
            bytes_accessed=n_pad * (_D_IN + _D_OUT) * 4 + _N_PARAMS * 4,
        ),
    )(params, xt)

    return yt[:, :n].T                               # (N, 1)


# ---------------------------------------------------------------------------
# Reference + init helpers.
# ---------------------------------------------------------------------------
def _init_linear(key, fan_in, fan_out):
    # PyTorch nn.Linear default init: U(-1/sqrt(fan_in), 1/sqrt(fan_in)).
    kw, kb = jax.random.split(key)
    bound = 1.0 / jnp.sqrt(fan_in)
    w = jax.random.uniform(kw, (fan_in, fan_out), jnp.float32, -bound, bound)
    b = jax.random.uniform(kb, (fan_out,), jnp.float32, -bound, bound)
    return w, b


def reference_forward(x, w1, b1, w2, b2, w3, b3):
    h1 = jax.nn.sigmoid(x @ w1 + b1)
    h2 = jax.nn.sigmoid(h1 @ w2 + b2)
    return jax.nn.sigmoid(h2 @ w3 + b3)


if __name__ == "__main__":
    key = jax.random.PRNGKey(0)
    kx, k1, k2, k3 = jax.random.split(key, 4)

    batch = 16
    x = jax.random.normal(kx, (batch, _D_IN), jnp.float32)

    w1, b1 = _init_linear(k1, _D_IN, _H1)
    w2, b2 = _init_linear(k2, _H1, _H2)
    w3, b3 = _init_linear(k3, _H2, _D_OUT)

    params = pack_params(w1, b1, w2, b2, w3, b3)
    assert params.shape == (_N_PARAMS,)

    y = mlp_forward(x, params)
    y = jax.block_until_ready(y)

    y_ref = reference_forward(x, w1, b1, w2, b2, w3, b3)
    assert y.shape == (batch, 1)
    assert jnp.allclose(y, y_ref, atol=1e-5, rtol=1e-5)

    print("KERNEL_OK")
</pallas_src>

<mosaic_0001>
module attributes {stable_mosaic.version = 11 : i64} {
  func.func @_mlp_kernel(%arg0: i32, %arg1: memref<87xf32, #tpu.memory_space<smem>>, %arg2: memref<8x128xf32, #tpu.memory_space<vmem>>, %arg3: memref<1x128xf32, #tpu.memory_space<vmem>>) attributes {dimension_semantics = [#tpu.dimension_semantics<parallel>], iteration_bounds = array<i64: 1>, scalar_prefetch = 0 : i64, scratch_operands = 0 : i64, tpu.core_type = #tpu.core_type<tc>, window_params = [{transform_indices = @transform_0, window_bounds = array<i64: 87>}, {transform_indices = @transform_1, window_bounds = array<i64: 8, 128>}, {transform_indices = @transform_2, window_bounds = array<i64: 1, 128>}]} {
    %c0 = arith.constant 0 : index
    %c0_0 = arith.constant 0 : index
    %0 = vector.load %arg2[%c0, %c0_0] : memref<8x128xf32, #tpu.memory_space<vmem>>, vector<8x128xf32>
    %1 = vector.extract_strided_slice %0 {offsets = [0, 0], sizes = [1, 128], strides = [1, 1]} : vector<8x128xf32> to vector<1x128xf32>
    %2 = vector.extract_strided_slice %0 {offsets = [1, 0], sizes = [1, 128], strides = [1, 1]} : vector<8x128xf32> to vector<1x128xf32>
    %3 = vector.extract_strided_slice %0 {offsets = [2, 0], sizes = [1, 128], strides = [1, 1]} : vector<8x128xf32> to vector<1x128xf32>
    %4 = vector.extract_strided_slice %0 {offsets = [3, 0], sizes = [1, 128], strides = [1, 1]} : vector<8x128xf32> to vector<1x128xf32>
    %5 = vector.extract_strided_slice %0 {offsets = [4, 0], sizes = [1, 128], strides = [1, 1]} : vector<8x128xf32> to vector<1x128xf32>
    %6 = vector.extract_strided_slice %0 {offsets = [5, 0], sizes = [1, 128], strides = [1, 1]} : vector<8x128xf32> to vector<1x128xf32>
    %7 = vector.extract_strided_slice %0 {offsets = [6, 0], sizes = [1, 128], strides = [1, 1]} : vector<8x128xf32> to vector<1x128xf32>
    %8 = vector.extract_strided_slice %0 {offsets = [7, 0], sizes = [1, 128], strides = [1, 1]} : vector<8x128xf32> to vector<1x128xf32>
    %c0_1 = arith.constant 0 : index
    %9 = memref.load %arg1[%c0_1] : memref<87xf32, #tpu.memory_space<smem>>
    %10 = vector.broadcast %9 : f32 to vector<1x128xf32>
    %11 = arith.mulf %1, %10 : vector<1x128xf32>
    %c6 = arith.constant 6 : index
    %12 = memref.load %arg1[%c6] : memref<87xf32, #tpu.memory_space<smem>>
    %13 = vector.broadcast %12 : f32 to vector<1x128xf32>
    %14 = arith.mulf %2, %13 : vector<1x128xf32>
    %15 = arith.addf %11, %14 : vector<1x128xf32>
    %c12 = arith.constant 12 : index
    %16 = memref.load %arg1[%c12] : memref<87xf32, #tpu.memory_space<smem>>
    %17 = vector.broadcast %16 : f32 to vector<1x128xf32>
    %18 = arith.mulf %3, %17 : vector<1x128xf32>
    %19 = arith.addf %15, %18 : vector<1x128xf32>
    %c18 = arith.constant 18 : index
    %20 = memref.load %arg1[%c18] : memref<87xf32, #tpu.memory_space<smem>>
    %21 = vector.broadcast %20 : f32 to vector<1x128xf32>
    %22 = arith.mulf %4, %21 : vector<1x128xf32>
    %23 = arith.addf %19, %22 : vector<1x128xf32>
    %c24 = arith.constant 24 : index
    %24 = memref.load %arg1[%c24] : memref<87xf32, #tpu.memory_space<smem>>
    %25 = vector.broadcast %24 : f32 to vector<1x128xf32>
    %26 = arith.mulf %5, %25 : vector<1x128xf32>
    %27 = arith.addf %23, %26 : vector<1x128xf32>
    %c30 = arith.constant 30 : index
    %28 = memref.load %arg1[%c30] : memref<87xf32, #tpu.memory_space<smem>>
    %29 = vector.broadcast %28 : f32 to vector<1x128xf32>
    %30 = arith.mulf %6, %29 : vector<1x128xf32>
    %31 = arith.addf %27, %30 : vector<1x128xf32>
    %c36 = arith.constant 36 : index
    %32 = memref.load %arg1[%c36] : memref<87xf32, #tpu.memory_space<smem>>
    %33 = vector.broadcast %32 : f32 to vector<1x128xf32>
    %34 = arith.mulf %7, %33 : vector<1x128xf32>
    %35 = arith.addf %31, %34 : vector<1x128xf32>
    %c42 = arith.constant 42 : index
    %36 = memref.load %arg1[%c42] : memref<87xf32, #tpu.memory_space<smem>>
    %37 = vector.broadcast %36 : f32 to vector<1x128xf32>
    %38 = arith.mulf %8, %37 : vector<1x128xf32>
    %39 = arith.addf %35, %38 : vector<1x128xf32>
    %c48 = arith.constant 48 : index
    %40 = memref.load %arg1[%c48] : memref<87xf32, #tpu.memory_space<smem>>
    %41 = vector.broadcast %40 : f32 to vector<1x128xf32>
    %42 = arith.addf %39, %41 : vector<1x128xf32>
    %cst = arith.constant 5.000000e-01 : f32
    %43 = vector.broadcast %cst : f32 to vector<1x128xf32>
    %44 = arith.mulf %43, %42 : vector<1x128xf32>
    %45 = math.tanh %44 : vector<1x128xf32>
    %cst_2 = arith.constant 1.000000e+00 : f32
    %46 = vector.broadcast %cst_2 : f32 to vector<1x128xf32>
    %47 = arith.addf %45, %46 : vector<1x128xf32>
    %cst_3 = arith.constant 5.000000e-01 : f32
    %48 = vector.broadcast %cst_3 : f32 to vector<1x128xf32>
    %49 = arith.mulf %48, %47 : vector<1x128xf32>
    %c1 = arith.constant 1 : index
    %50 = memref.load %arg1[%c1] : memref<87xf32, #tpu.memory_space<smem>>
    %51 = vector.broadcast %50 : f32 to vector<1x128xf32>
    %52 = arith.mulf %1, %51 : vector<1x128xf32>
    %c7 = arith.constant 7 : index
    %53 = memref.load %arg1[%c7] : memref<87xf32, #tpu.memory_space<smem>>
    %54 = vector.broadcast %53 : f32 to vector<1x128xf32>
    %55 = arith.mulf %2, %54 : vector<1x128xf32>
    %56 = arith.addf %52, %55 : vector<1x128xf32>
    %c13 = arith.constant 13 : index
    %57 = memref.load %arg1[%c13] : memref<87xf32, #tpu.memory_space<smem>>
    %58 = vector.broadcast %57 : f32 to vector<1x128xf32>
    %59 = arith.mulf %3, %58 : vector<1x128xf32>
    %60 = arith.addf %56, %59 : vector<1x128xf32>
    %c19 = arith.constant 19 : index
    %61 = memref.load %arg1[%c19] : memref<87xf32, #tpu.memory_space<smem>>
    %62 = vector.broadcast %61 : f32 to vector<1x128xf32>
    %63 = arith.mulf %4, %62 : vector<1x128xf32>
    %64 = arith.addf %60, %63 : vector<1x128xf32>
    %c25 = arith.constant 25 : index
    %65 = memref.load %arg1[%c25] : memref<87xf32, #tpu.memory_space<smem>>
    %66 = vector.broadcast %65 : f32 to vector<1x128xf32>
    %67 = arith.mulf %5, %66 : vector<1x128xf32>
    %68 = arith.addf %64, %67 : vector<1x128xf32>
    %c31 = arith.constant 31 : index
    %69 = memref.load %arg1[%c31] : memref<87xf32, #tpu.memory_space<smem>>
    %70 = vector.broadcast %69 : f32 to vector<1x128xf32>
    %71 = arith.mulf %6, %70 : vector<1x128xf32>
    %72 = arith.addf %68, %71 : vector<1x128xf32>
    %c37 = arith.constant 37 : index
    %73 = memref.load %arg1[%c37] : memref<87xf32, #tpu.memory_space<smem>>
    %74 = vector.broadcast %73 : f32 to vector<1x128xf32>
    %75 = arith.mulf %7, %74 : vector<1x128xf32>
    %76 = arith.addf %72, %75 : vector<1x128xf32>
    %c43 = arith.constant 43 : index
    %77 = memref.load %arg1[%c43] : memref<87xf32, #tpu.memory_space<smem>>
    %78 = vector.broadcast %77 : f32 to vector<1x128xf32>
    %79 = arith.mulf %8, %78 : vector<1x128xf32>
    %80 = arith.addf %76, %79 : vector<1x128xf32>
    %c49 = arith.constant 49 : index
    %81 = memref.load %arg1[%c49] : memref<87xf32, #tpu.memory_space<smem>>
    %82 = vector.broadcast %81 : f32 to vector<1x128xf32>
    %83 = arith.addf %80, %82 : vector<1x128xf32>
    %cst_4 = arith.constant 5.000000e-01 : f32
    %84 = vector.broadcast %cst_4 : f32 to vector<1x128xf32>
    %85 = arith.mulf %84, %83 : vector<1x128xf32>
    %86 = math.tanh %85 : vector<1x128xf32>
    %cst_5 = arith.constant 1.000000e+00 : f32
    %87 = vector.broadcast %cst_5 : f32 to vector<1x128xf32>
    %88 = arith.addf %86, %87 : vector<1x128xf32>
    %cst_6 = arith.constant 5.000000e-01 : f32
    %89 = vector.broadcast %cst_6 : f32 to vector<1x128xf32>
    %90 = arith.mulf %89, %88 : vector<1x128xf32>
    %c2 = arith.constant 2 : index
    %91 = memref.load %arg1[%c2] : memref<87xf32, #tpu.memory_space<smem>>
    %92 = vector.broadcast %91 : f32 to vector<1x128xf32>
    %93 = arith.mulf %1, %92 : vector<1x128xf32>
    %c8 = arith.constant 8 : index
    %94 = memref.load %arg1[%c8] : memref<87xf32, #tpu.memory_space<smem>>
    %95 = vector.broadcast %94 : f32 to vector<1x128xf32>
    %96 = arith.mulf %2, %95 : vector<1x128xf32>
    %97 = arith.addf %93, %96 : vector<1x128xf32>
    %c14 = arith.constant 14 : index
    %98 = memref.load %arg1[%c14] : memref<87xf32, #tpu.memory_space<smem>>
    %99 = vector.broadcast %98 : f32 to vector<1x128xf32>
    %100 = arith.mulf %3, %99 : vector<1x128xf32>
    %101 = arith.addf %97, %100 : vector<1x128xf32>
    %c20 = arith.constant 20 : index
    %102 = memref.load %arg1[%c20] : memref<87xf32, #tpu.memory_space<smem>>
    %103 = vector.broadcast %102 : f32 to vector<1x128xf32>
    %104 = arith.mulf %4, %103 : vector<1x128xf32>
    %105 = arith.addf %101, %104 : vector<1x128xf32>
    %c26 = arith.constant 26 : index
    %106 = memref.load %arg1[%c26] : memref<87xf32, #tpu.memory_space<smem>>
    %107 = vector.broadcast %106 : f32 to vector<1x128xf32>
    %108 = arith.mulf %5, %107 : vector<1x128xf32>
    %109 = arith.addf %105, %108 : vector<1x128xf32>
    %c32 = arith.constant 32 : index
    %110 = memref.load %arg1[%c32] : memref<87xf32, #tpu.memory_space<smem>>
    %111 = vector.broadcast %110 : f32 to vector<1x128xf32>
    %112 = arith.mulf %6, %111 : vector<1x128xf32>
    %113 = arith.addf %109, %112 : vector<1x128xf32>
    %c38 = arith.constant 38 : index
    %114 = memref.load %arg1[%c38] : memref<87xf32, #tpu.memory_space<smem>>
    %115 = vector.broadcast %114 : f32 to vector<1x128xf32>
    %116 = arith.mulf %7, %115 : vector<1x128xf32>
    %117 = arith.addf %113, %116 : vector<1x128xf32>
    %c44 = arith.constant 44 : index
    %118 = memref.load %arg1[%c44] : memref<87xf32, #tpu.memory_space<smem>>
    %119 = vector.broadcast %118 : f32 to vector<1x128xf32>
    %120 = arith.mulf %8, %119 : vector<1x128xf32>
    %121 = arith.addf %117, %120 : vector<1x128xf32>
    %c50 = arith.constant 50 : index
    %122 = memref.load %arg1[%c50] : memref<87xf32, #tpu.memory_space<smem>>
    %123 = vector.broadcast %122 : f32 to vector<1x128xf32>
    %124 = arith.addf %121, %123 : vector<1x128xf32>
    %cst_7 = arith.constant 5.000000e-01 : f32
    %125 = vector.broadcast %cst_7 : f32 to vector<1x128xf32>
    %126 = arith.mulf %125, %124 : vector<1x128xf32>
    %127 = math.tanh %126 : vector<1x128xf32>
    %cst_8 = arith.constant 1.000000e+00 : f32
    %128 = vector.broadcast %cst_8 : f32 to vector<1x128xf32>
    %129 = arith.addf %127, %128 : vector<1x128xf32>
    %cst_9 = arith.constant 5.000000e-01 : f32
    %130 = vector.broadcast %cst_9 : f32 to vector<1x128xf32>
    %131 = arith.mulf %130, %129 : vector<1x128xf32>
    %c3 = arith.constant 3 : index
    %132 = memref.load %arg1[%c3] : memref<87xf32, #tpu.memory_space<smem>>
    %133 = vector.broadcast %132 : f32 to vector<1x128xf32>
    %134 = arith.mulf %1, %133 : vector<1x128xf32>
    %c9 = arith.constant 9 : index
    %135 = memref.load %arg1[%c9] : memref<87xf32, #tpu.memory_space<smem>>
    %136 = vector.broadcast %135 : f32 to vector<1x128xf32>
    %137 = arith.mulf %2, %136 : vector<1x128xf32>
    %138 = arith.addf %134, %137 : vector<1x128xf32>
    %c15 = arith.constant 15 : index
    %139 = memref.load %arg1[%c15] : memref<87xf32, #tpu.memory_space<smem>>
    %140 = vector.broadcast %139 : f32 to vector<1x128xf32>
    %141 = arith.mulf %3, %140 : vector<1x128xf32>
    %142 = arith.addf %138, %141 : vector<1x128xf32>
    %c21 = arith.constant 21 : index
    %143 = memref.load %arg1[%c21] : memref<87xf32, #tpu.memory_space<smem>>
    %144 = vector.broadcast %143 : f32 to vector<1x128xf32>
    %145 = arith.mulf %4, %144 : vector<1x128xf32>
    %146 = arith.addf %142, %145 : vector<1x128xf32>
    %c27 = arith.constant 27 : index
    %147 = memref.load %arg1[%c27] : memref<87xf32, #tpu.memory_space<smem>>
    %148 = vector.broadcast %147 : f32 to vector<1x128xf32>
    %149 = arith.mulf %5, %148 : vector<1x128xf32>
    %150 = arith.addf %146, %149 : vector<1x128xf32>
    %c33 = arith.constant 33 : index
    %151 = memref.load %arg1[%c33] : memref<87xf32, #tpu.memory_space<smem>>
    %152 = vector.broadcast %151 : f32 to vector<1x128xf32>
    %153 = arith.mulf %6, %152 : vector<1x128xf32>
    %154 = arith.addf %150, %153 : vector<1x128xf32>
    %c39 = arith.constant 39 : index
    %155 = memref.load %arg1[%c39] : memref<87xf32, #tpu.memory_space<smem>>
    %156 = vector.broadcast %155 : f32 to vector<1x128xf32>
    %157 = arith.mulf %7, %156 : vector<1x128xf32>
    %158 = arith.addf %154, %157 : vector<1x128xf32>
    %c45 = arith.constant 45 : index
    %159 = memref.load %arg1[%c45] : memref<87xf32, #tpu.memory_space<smem>>
    %160 = vector.broadcast %159 : f32 to vector<1x128xf32>
    %161 = arith.mulf %8, %160 : vector<1x128xf32>
    %162 = arith.addf %158, %161 : vector<1x128xf32>
    %c51 = arith.constant 51 : index
    %163 = memref.load %arg1[%c51] : memref<87xf32, #tpu.memory_space<smem>>
    %164 = vector.broadcast %163 : f32 to vector<1x128xf32>
    %165 = arith.addf %162, %164 : vector<1x128xf32>
    %cst_10 = arith.constant 5.000000e-01 : f32
    %166 = vector.broadcast %cst_10 : f32 to vector<1x128xf32>
    %167 = arith.mulf %166, %165 : vector<1x128xf32>
    %168 = math.tanh %167 : vector<1x128xf32>
    %cst_11 = arith.constant 1.000000e+00 : f32
    %169 = vector.broadcast %cst_11 : f32 to vector<1x128xf32>
    %170 = arith.addf %168, %169 : vector<1x128xf32>
    %cst_12 = arith.constant 5.000000e-01 : f32
    %171 = vector.broadcast %cst_12 : f32 to vector<1x128xf32>
    %172 = arith.mulf %171, %170 : vector<1x128xf32>
    %c4 = arith.constant 4 : index
    %173 = memref.load %arg1[%c4] : memref<87xf32, #tpu.memory_space<smem>>
    %174 = vector.broadcast %173 : f32 to vector<1x128xf32>
    %175 = arith.mulf %1, %174 : vector<1x128xf32>
    %c10 = arith.constant 10 : index
    %176 = memref.load %arg1[%c10] : memref<87xf32, #tpu.memory_space<smem>>
    %177 = vector.broadcast %176 : f32 to vector<1x128xf32>
    %178 = arith.mulf %2, %177 : vector<1x128xf32>
    %179 = arith.addf %175, %178 : vector<1x128xf32>
    %c16 = arith.constant 16 : index
    %180 = memref.load %arg1[%c16] : memref<87xf32, #tpu.memory_space<smem>>
    %181 = vector.broadcast %180 : f32 to vector<1x128xf32>
    %182 = arith.mulf %3, %181 : vector<1x128xf32>
    %183 = arith.addf %179, %182 : vector<1x128xf32>
    %c22 = arith.constant 22 : index
    %184 = memref.load %arg1[%c22] : memref<87xf32, #tpu.memory_space<smem>>
    %185 = vector.broadcast %184 : f32 to vector<1x128xf32>
    %186 = arith.mulf %4, %185 : vector<1x128xf32>
    %187 = arith.addf %183, %186 : vector<1x128xf32>
    %c28 = arith.constant 28 : index
    %188 = memref.load %arg1[%c28] : memref<87xf32, #tpu.memory_space<smem>>
    %189 = vector.broadcast %188 : f32 to vector<1x128xf32>
    %190 = arith.mulf %5, %189 : vector<1x128xf32>
    %191 = arith.addf %187, %190 : vector<1x128xf32>
    %c34 = arith.constant 34 : index
    %192 = memref.load %arg1[%c34] : memref<87xf32, #tpu.memory_space<smem>>
    %193 = vector.broadcast %192 : f32 to vector<1x128xf32>
    %194 = arith.mulf %6, %193 : vector<1x128xf32>
    %195 = arith.addf %191, %194 : vector<1x128xf32>
    %c40 = arith.constant 40 : index
    %196 = memref.load %arg1[%c40] : memref<87xf32, #tpu.memory_space<smem>>
    %197 = vector.broadcast %196 : f32 to vector<1x128xf32>
    %198 = arith.mulf %7, %197 : vector<1x128xf32>
    %199 = arith.addf %195, %198 : vector<1x128xf32>
    %c46 = arith.constant 46 : index
    %200 = memref.load %arg1[%c46] : memref<87xf32, #tpu.memory_space<smem>>
    %201 = vector.broadcast %200 : f32 to vector<1x128xf32>
    %202 = arith.mulf %8, %201 : vector<1x128xf32>
    %203 = arith.addf %199, %202 : vector<1x128xf32>
    %c52 = arith.constant 52 : index
    %204 = memref.load %arg1[%c52] : memref<87xf32, #tpu.memory_space<smem>>
    %205 = vector.broadcast %204 : f32 to vector<1x128xf32>
    %206 = arith.addf %203, %205 : vector<1x128xf32>
    %cst_13 = arith.constant 5.000000e-01 : f32
    %207 = vector.broadcast %cst_13 : f32 to vector<1x128xf32>
    %208 = arith.mulf %207, %206 : vector<1x128xf32>
    %209 = math.tanh %208 : vector<1x128xf32>
    %cst_14 = arith.constant 1.000000e+00 : f32
    %210 = vector.broadcast %cst_14 : f32 to vector<1x128xf32>
    %211 = arith.addf %209, %210 : vector<1x128xf32>
    %cst_15 = arith.constant 5.000000e-01 : f32
    %212 = vector.broadcast %cst_15 : f32 to vector<1x128xf32>
    %213 = arith.mulf %212, %211 : vector<1x128xf32>
    %c5 = arith.constant 5 : index
    %214 = memref.load %arg1[%c5] : memref<87xf32, #tpu.memory_space<smem>>
    %215 = vector.broadcast %214 : f32 to vector<1x128xf32>
    %216 = arith.mulf %1, %215 : vector<1x128xf32>
    %c11 = arith.constant 11 : index
    %217 = memref.load %arg1[%c11] : memref<87xf32, #tpu.memory_space<smem>>
    %218 = vector.broadcast %217 : f32 to vector<1x128xf32>
    %219 = arith.mulf %2, %218 : vector<1x128xf32>
    %220 = arith.addf %216, %219 : vector<1x128xf32>
    %c17 = arith.constant 17 : index
    %221 = memref.load %arg1[%c17] : memref<87xf32, #tpu.memory_space<smem>>
    %222 = vector.broadcast %221 : f32 to vector<1x128xf32>
    %223 = arith.mulf %3, %222 : vector<1x128xf32>
    %224 = arith.addf %220, %223 : vector<1x128xf32>
    %c23 = arith.constant 23 : index
    %225 = memref.load %arg1[%c23] : memref<87xf32, #tpu.memory_space<smem>>
    %226 = vector.broadcast %225 : f32 to vector<1x128xf32>
    %227 = arith.mulf %4, %226 : vector<1x128xf32>
    %228 = arith.addf %224, %227 : vector<1x128xf32>
    %c29 = arith.constant 29 : index
    %229 = memref.load %arg1[%c29] : memref<87xf32, #tpu.memory_space<smem>>
    %230 = vector.broadcast %229 : f32 to vector<1x128xf32>
    %231 = arith.mulf %5, %230 : vector<1x128xf32>
    %232 = arith.addf %228, %231 : vector<1x128xf32>
    %c35 = arith.constant 35 : index
    %233 = memref.load %arg1[%c35] : memref<87xf32, #tpu.memory_space<smem>>
    %234 = vector.broadcast %233 : f32 to vector<1x128xf32>
    %235 = arith.mulf %6, %234 : vector<1x128xf32>
    %236 = arith.addf %232, %235 : vector<1x128xf32>
    %c41 = arith.constant 41 : index
    %237 = memref.load %arg1[%c41] : memref<87xf32, #tpu.memory_space<smem>>
    %238 = vector.broadcast %237 : f32 to vector<1x128xf32>
    %239 = arith.mulf %7, %238 : vector<1x128xf32>
    %240 = arith.addf %236, %239 : vector<1x128xf32>
    %c47 = arith.constant 47 : index
    %241 = memref.load %arg1[%c47] : memref<87xf32, #tpu.memory_space<smem>>
    %242 = vector.broadcast %241 : f32 to vector<1x128xf32>
    %243 = arith.mulf %8, %242 : vector<1x128xf32>
    %244 = arith.addf %240, %243 : vector<1x128xf32>
    %c53 = arith.constant 53 : index
    %245 = memref.load %arg1[%c53] : memref<87xf32, #tpu.memory_space<smem>>
    %246 = vector.broadcast %245 : f32 to vector<1x128xf32>
    %247 = arith.addf %244, %246 : vector<1x128xf32>
    %cst_16 = arith.constant 5.000000e-01 : f32
    %248 = vector.broadcast %cst_16 : f32 to vector<1x128xf32>
    %249 = arith.mulf %248, %247 : vector<1x128xf32>
    %250 = math.tanh %249 : vector<1x128xf32>
    %cst_17 = arith.constant 1.000000e+00 : f32
    %251 = vector.broadcast %cst_17 : f32 to vector<1x128xf32>
    %252 = arith.addf %250, %251 : vector<1x128xf32>
    %cst_18 = arith.constant 5.000000e-01 : f32
    %253 = vector.broadcast %cst_18 : f32 to vector<1x128xf32>
    %254 = arith.mulf %253, %252 : vector<1x128xf32>
    %c54 = arith.constant 54 : index
    %255 = memref.load %arg1[%c54] : memref<87xf32, #tpu.memory_space<smem>>
    %256 = vector.broadcast %255 : f32 to vector<1x128xf32>
    %257 = arith.mulf %49, %256 : vector<1x128xf32>
    %c58 = arith.constant 58 : index
    %258 = memref.load %arg1[%c58] : memref<87xf32, #tpu.memory_space<smem>>
    %259 = vector.broadcast %258 : f32 to vector<1x128xf32>
    %260 = arith.mulf %90, %259 : vector<1x128xf32>
    %261 = arith.addf %257, %260 : vector<1x128xf32>
    %c62 = arith.constant 62 : index
    %262 = memref.load %arg1[%c62] : memref<87xf32, #tpu.memory_space<smem>>
    %263 = vector.broadcast %262 : f32 to vector<1x128xf32>
    %264 = arith.mulf %131, %263 : vector<1x128xf32>
    %265 = arith.addf %261, %264 : vector<1x128xf32>
    %c66 = arith.constant 66 : index
    %266 = memref.load %arg1[%c66] : memref<87xf32, #tpu.memory_space<smem>>
    %267 = vector.broadcast %266 : f32 to vector<1x128xf32>
    %268 = arith.mulf %172, %267 : vector<1x128xf32>
    %269 = arith.addf %265, %268 : vector<1x128xf32>
    %c70 = arith.constant 70 : index
    %270 = memref.load %arg1[%c70] : memref<87xf32, #tpu.memory_space<smem>>
    %271 = vector.broadcast %270 : f32 to vector<1x128xf32>
    %272 = arith.mulf %213, %271 : vector<1x128xf32>
    %273 = arith.addf %269, %272 : vector<1x128xf32>
    %c74 = arith.constant 74 : index
    %274 = memref.load %arg1[%c74] : memref<87xf32, #tpu.memory_space<smem>>
    %275 = vector.broadcast %274 : f32 to vector<1x128xf32>
    %276 = arith.mulf %254, %275 : vector<1x128xf32>
    %277 = arith.addf %273, %276 : vector<1x128xf32>
    %c78 = arith.constant 78 : index
    %278 = memref.load %arg1[%c78] : memref<87xf32, #tpu.memory_space<smem>>
    %279 = vector.broadcast %278 : f32 to vector<1x128xf32>
    %280 = arith.addf %277, %279 : vector<1x128xf32>
    %cst_19 = arith.constant 5.000000e-01 : f32
    %281 = vector.broadcast %cst_19 : f32 to vector<1x128xf32>
    %282 = arith.mulf %281, %280 : vector<1x128xf32>
    %283 = math.tanh %282 : vector<1x128xf32>
    %cst_20 = arith.constant 1.000000e+00 : f32
    %284 = vector.broadcast %cst_20 : f32 to vector<1x128xf32>
    %285 = arith.addf %283, %284 : vector<1x128xf32>
    %cst_21 = arith.constant 5.000000e-01 : f32
    %286 = vector.broadcast %cst_21 : f32 to vector<1x128xf32>
    %287 = arith.mulf %286, %285 : vector<1x128xf32>
    %c55 = arith.constant 55 : index
    %288 = memref.load %arg1[%c55] : memref<87xf32, #tpu.memory_space<smem>>
    %289 = vector.broadcast %288 : f32 to vector<1x128xf32>
    %290 = arith.mulf %49, %289 : vector<1x128xf32>
    %c59 = arith.constant 59 : index
    %291 = memref.load %arg1[%c59] : memref<87xf32, #tpu.memory_space<smem>>
    %292 = vector.broadcast %291 : f32 to vector<1x128xf32>
    %293 = arith.mulf %90, %292 : vector<1x128xf32>
    %294 = arith.addf %290, %293 : vector<1x128xf32>
    %c63 = arith.constant 63 : index
    %295 = memref.load %arg1[%c63] : memref<87xf32, #tpu.memory_space<smem>>
    %296 = vector.broadcast %295 : f32 to vector<1x128xf32>
    %297 = arith.mulf %131, %296 : vector<1x128xf32>
    %298 = arith.addf %294, %297 : vector<1x128xf32>
    %c67 = arith.constant 67 : index
    %299 = memref.load %arg1[%c67] : memref<87xf32, #tpu.memory_space<smem>>
    %300 = vector.broadcast %299 : f32 to vector<1x128xf32>
    %301 = arith.mulf %172, %300 : vector<1x128xf32>
    %302 = arith.addf %298, %301 : vector<1x128xf32>
    %c71 = arith.constant 71 : index
    %303 = memref.load %arg1[%c71] : memref<87xf32, #tpu.memory_space<smem>>
    %304 = vector.broadcast %303 : f32 to vector<1x128xf32>
    %305 = arith.mulf %213, %304 : vector<1x128xf32>
    %306 = arith.addf %302, %305 : vector<1x128xf32>
    %c75 = arith.constant 75 : index
    %307 = memref.load %arg1[%c75] : memref<87xf32, #tpu.memory_space<smem>>
    %308 = vector.broadcast %307 : f32 to vector<1x128xf32>
    %309 = arith.mulf %254, %308 : vector<1x128xf32>
    %310 = arith.addf %306, %309 : vector<1x128xf32>
    %c79 = arith.constant 79 : index
    %311 = memref.load %arg1[%c79] : memref<87xf32, #tpu.memory_space<smem>>
    %312 = vector.broadcast %311 : f32 to vector<1x128xf32>
    %313 = arith.addf %310, %312 : vector<1x128xf32>
    %cst_22 = arith.constant 5.000000e-01 : f32
    %314 = vector.broadcast %cst_22 : f32 to vector<1x128xf32>
    %315 = arith.mulf %314, %313 : vector<1x128xf32>
    %316 = math.tanh %315 : vector<1x128xf32>
    %cst_23 = arith.constant 1.000000e+00 : f32
    %317 = vector.broadcast %cst_23 : f32 to vector<1x128xf32>
    %318 = arith.addf %316, %317 : vector<1x128xf32>
    %cst_24 = arith.constant 5.000000e-01 : f32
    %319 = vector.broadcast %cst_24 : f32 to vector<1x128xf32>
    %320 = arith.mulf %319, %318 : vector<1x128xf32>
    %c56 = arith.constant 56 : index
    %321 = memref.load %arg1[%c56] : memref<87xf32, #tpu.memory_space<smem>>
    %322 = vector.broadcast %321 : f32 to vector<1x128xf32>
    %323 = arith.mulf %49, %322 : vector<1x128xf32>
    %c60 = arith.constant 60 : index
    %324 = memref.load %arg1[%c60] : memref<87xf32, #tpu.memory_space<smem>>
    %325 = vector.broadcast %324 : f32 to vector<1x128xf32>
    %326 = arith.mulf %90, %325 : vector<1x128xf32>
    %327 = arith.addf %323, %326 : vector<1x128xf32>
    %c64 = arith.constant 64 : index
    %328 = memref.load %arg1[%c64] : memref<87xf32, #tpu.memory_space<smem>>
    %329 = vector.broadcast %328 : f32 to vector<1x128xf32>
    %330 = arith.mulf %131, %329 : vector<1x128xf32>
    %331 = arith.addf %327, %330 : vector<1x128xf32>
    %c68 = arith.constant 68 : index
    %332 = memref.load %arg1[%c68] : memref<87xf32, #tpu.memory_space<smem>>
    %333 = vector.broadcast %332 : f32 to vector<1x128xf32>
    %334 = arith.mulf %172, %333 : vector<1x128xf32>
    %335 = arith.addf %331, %334 : vector<1x128xf32>
    %c72 = arith.constant 72 : index
    %336 = memref.load %arg1[%c72] : memref<87xf32, #tpu.memory_space<smem>>
    %337 = vector.broadcast %336 : f32 to vector<1x128xf32>
    %338 = arith.mulf %213, %337 : vector<1x128xf32>
    %339 = arith.addf %335, %338 : vector<1x128xf32>
    %c76 = arith.constant 76 : index
    %340 = memref.load %arg1[%c76] : memref<87xf32, #tpu.memory_space<smem>>
    %341 = vector.broadcast %340 : f32 to vector<1x128xf32>
    %342 = arith.mulf %254, %341 : vector<1x128xf32>
    %343 = arith.addf %339, %342 : vector<1x128xf32>
    %c80 = arith.constant 80 : index
    %344 = memref.load %arg1[%c80] : memref<87xf32, #tpu.memory_space<smem>>
    %345 = vector.broadcast %344 : f32 to vector<1x128xf32>
    %346 = arith.addf %343, %345 : vector<1x128xf32>
    %cst_25 = arith.constant 5.000000e-01 : f32
    %347 = vector.broadcast %cst_25 : f32 to vector<1x128xf32>
    %348 = arith.mulf %347, %346 : vector<1x128xf32>
    %349 = math.tanh %348 : vector<1x128xf32>
    %cst_26 = arith.constant 1.000000e+00 : f32
    %350 = vector.broadcast %cst_26 : f32 to vector<1x128xf32>
    %351 = arith.addf %349, %350 : vector<1x128xf32>
    %cst_27 = arith.constant 5.000000e-01 : f32
    %352 = vector.broadcast %cst_27 : f32 to vector<1x128xf32>
    %353 = arith.mulf %352, %351 : vector<1x128xf32>
    %c57 = arith.constant 57 : index
    %354 = memref.load %arg1[%c57] : memref<87xf32, #tpu.memory_space<smem>>
    %355 = vector.broadcast %354 : f32 to vector<1x128xf32>
    %356 = arith.mulf %49, %355 : vector<1x128xf32>
    %c61 = arith.constant 61 : index
    %357 = memref.load %arg1[%c61] : memref<87xf32, #tpu.memory_space<smem>>
    %358 = vector.broadcast %357 : f32 to vector<1x128xf32>
    %359 = arith.mulf %90, %358 : vector<1x128xf32>
    %360 = arith.addf %356, %359 : vector<1x128xf32>
    %c65 = arith.constant 65 : index
    %361 = memref.load %arg1[%c65] : memref<87xf32, #tpu.memory_space<smem>>
    %362 = vector.broadcast %361 : f32 to vector<1x128xf32>
    %363 = arith.mulf %131, %362 : vector<1x128xf32>
    %364 = arith.addf %360, %363 : vector<1x128xf32>
    %c69 = arith.constant 69 : index
    %365 = memref.load %arg1[%c69] : memref<87xf32, #tpu.memory_space<smem>>
    %366 = vector.broadcast %365 : f32 to vector<1x128xf32>
    %367 = arith.mulf %172, %366 : vector<1x128xf32>
    %368 = arith.addf %364, %367 : vector<1x128xf32>
    %c73 = arith.constant 73 : index
    %369 = memref.load %arg1[%c73] : memref<87xf32, #tpu.memory_space<smem>>
    %370 = vector.broadcast %369 : f32 to vector<1x128xf32>
    %371 = arith.mulf %213, %370 : vector<1x128xf32>
    %372 = arith.addf %368, %371 : vector<1x128xf32>
    %c77 = arith.constant 77 : index
    %373 = memref.load %arg1[%c77] : memref<87xf32, #tpu.memory_space<smem>>
    %374 = vector.broadcast %373 : f32 to vector<1x128xf32>
    %375 = arith.mulf %254, %374 : vector<1x128xf32>
    %376 = arith.addf %372, %375 : vector<1x128xf32>
    %c81 = arith.constant 81 : index
    %377 = memref.load %arg1[%c81] : memref<87xf32, #tpu.memory_space<smem>>
    %378 = vector.broadcast %377 : f32 to vector<1x128xf32>
    %379 = arith.addf %376, %378 : vector<1x128xf32>
    %cst_28 = arith.constant 5.000000e-01 : f32
    %380 = vector.broadcast %cst_28 : f32 to vector<1x128xf32>
    %381 = arith.mulf %380, %379 : vector<1x128xf32>
    %382 = math.tanh %381 : vector<1x128xf32>
    %cst_29 = arith.constant 1.000000e+00 : f32
    %383 = vector.broadcast %cst_29 : f32 to vector<1x128xf32>
    %384 = arith.addf %382, %383 : vector<1x128xf32>
    %cst_30 = arith.constant 5.000000e-01 : f32
    %385 = vector.broadcast %cst_30 : f32 to vector<1x128xf32>
    %386 = arith.mulf %385, %384 : vector<1x128xf32>
    %c82 = arith.constant 82 : index
    %387 = memref.load %arg1[%c82] : memref<87xf32, #tpu.memory_space<smem>>
    %388 = vector.broadcast %387 : f32 to vector<1x128xf32>
    %389 = arith.mulf %287, %388 : vector<1x128xf32>
    %c83 = arith.constant 83 : index
    %390 = memref.load %arg1[%c83] : memref<87xf32, #tpu.memory_space<smem>>
    %391 = vector.broadcast %390 : f32 to vector<1x128xf32>
    %392 = arith.mulf %320, %391 : vector<1x128xf32>
    %393 = arith.addf %389, %392 : vector<1x128xf32>
    %c84 = arith.constant 84 : index
    %394 = memref.load %arg1[%c84] : memref<87xf32, #tpu.memory_space<smem>>
    %395 = vector.broadcast %394 : f32 to vector<1x128xf32>
    %396 = arith.mulf %353, %395 : vector<1x128xf32>
    %397 = arith.addf %393, %396 : vector<1x128xf32>
    %c85 = arith.constant 85 : index
    %398 = memref.load %arg1[%c85] : memref<87xf32, #tpu.memory_space<smem>>
    %399 = vector.broadcast %398 : f32 to vector<1x128xf32>
    %400 = arith.mulf %386, %399 : vector<1x128xf32>
    %401 = arith.addf %397, %400 : vector<1x128xf32>
    %c86 = arith.constant 86 : index
    %402 = memref.load %arg1[%c86] : memref<87xf32, #tpu.memory_space<smem>>
    %403 = vector.broadcast %402 : f32 to vector<1x128xf32>
    %404 = arith.addf %401, %403 : vector<1x128xf32>
    %cst_31 = arith.constant 5.000000e-01 : f32
    %405 = vector.broadcast %cst_31 : f32 to vector<1x128xf32>
    %406 = arith.mulf %405, %404 : vector<1x128xf32>
    %407 = math.tanh %406 : vector<1x128xf32>
    %cst_32 = arith.constant 1.000000e+00 : f32
    %408 = vector.broadcast %cst_32 : f32 to vector<1x128xf32>
    %409 = arith.addf %407, %408 : vector<1x128xf32>
    %cst_33 = arith.constant 5.000000e-01 : f32
    %410 = vector.broadcast %cst_33 : f32 to vector<1x128xf32>
    %411 = arith.mulf %410, %409 : vector<1x128xf32>
    %c0_34 = arith.constant 0 : index
    %c0_35 = arith.constant 0 : index
    %412 = vector.load %arg3[%c0_34, %c0_35] : memref<1x128xf32, #tpu.memory_space<vmem>>, vector<1x128xf32>
    tpu.vector_store %arg3[%c0_34, %c0_35], %411 {strides = array<i32>} : memref<1x128xf32, #tpu.memory_space<vmem>>, vector<1x128xf32>,
    return
  }
  func.func @transform_0(%arg0: i32) -> i32 {
    %c0_i32 = arith.constant 0 : i32
    %c0_i32_0 = arith.constant 0 : i32
    return %c0_i32 : i32
  }
  func.func @transform_1(%arg0: i32) -> (i32, i32) {
    %c0_i32 = arith.constant 0 : i32
    %c0_i32_0 = arith.constant 0 : i32
    return %c0_i32, %arg0 : i32, i32
  }
  func.func @transform_2(%arg0: i32) -> (i32, i32) {
    %c0_i32 = arith.constant 0 : i32
    %c0_i32_0 = arith.constant 0 : i32
    return %c0_i32, %arg0 : i32, i32
  }
}

</mosaic_0001>

<bundles_post_ra>
// kernel: mlp_forward.1
= control target key start
LH: loop header
LB: loop body
LE: loop exit
PB: predicated region body
PF: predicated region fallthrough
CT: control target
= control target key end

     0   :  { %7 = vsyncpa [#allocation3], 0  ;;  %s650_s12 = smov [#allocation2]   ;;  %s908_s0 = inlined_call_operand.vmem [shape: f32[87], index: 0, kind: input, shape index: {}]   ;;  %s909_s1 = inlined_call_operand.vmem [shape: f32[8,128], index: 1, kind: input, shape index: {}]   ;;  %s910_s2 = inlined_call_operand.vmem [shape: f32[1,128], index: 2, kind: output, shape index: {}]  }
   0x1   :  { %s13_s11 = sshll.u32 %s908_s0, 4  ;;  %s14_s11 = int_to_ptr.vmem [resolvable:$true] %s13_s11 }
   0x2   :  { %16 = dma.vmem_to_smem %s14_s11, 16, %s650_s12, [#allocation3]  }
   0x3   :  { %648 = dma.done.wait [#allocation3], 16  }
   0x4   :  { %649 = vsyncadd [#allocation3], 4294967280 }
   0x5   :  { %23 = sfence }
   0x6   :  { %s25_s13 = sld [smem:[#allocation2]]  ;;  %v672_v0 = vld [vmem:[%s909_s1] sm:$0xff] }
   0x7   :  { %s527_s14 = sld [smem:[#allocation2 + $0x6]] }
   0x8   :  { %s528_s15 = sld [smem:[#allocation2 + $0xc]] }
   0x9   :  { %s529_s16 = sld [smem:[#allocation2 + $0x12]] }
   0xa   :  { %s530_s17 = sld [smem:[#allocation2 + $0x18]] }
   0xb   :  { %s531_s20 = sld [smem:[#allocation2 + $0x1e]] }
   0xc   :  { %v26_v1 = vstv %s25_s13  ;;  %s532_s21 = sld [smem:[#allocation2 + $0x24]] }
   0xd   :  { %v29_v2 = vstv %s527_s14  ;;  %s533_s0 = sld [smem:[#allocation2 + $0x2a]]  ;;  %v27_v3 = vmul.f32 %v26_v1, %v672_v0 }
   0xe   :  { %v30_v4 = vmul.f32 %v29_v2, %v672_v0  ;;  %v36_v5 = vstv %s528_s15  ;;  %s676_s22 = sld [smem:[#allocation2 + $0x30]] }
   0xf   :  { %v37_v6 = vmul.f32 %v36_v5, %v672_v0  ;;  %v43_v7 = vstv %s529_s16  ;;  %s535_s23 = sld [smem:[#allocation2 + $0x1]] }
  0x10   :  { %v32_v8 = vrot.slane %v30_v4, 1  ;;  %v44_v9 = vmul.f32 %v43_v7, %v672_v0  ;;  %v50_v10 = vstv %s530_s17  ;;  %s536_s1 = sld [smem:[#allocation2 + $0x7]] }
  0x11   :  { %v39_v11 = vrot.slane %v37_v6, 2  ;;  %v51_v12 = vmul.f32 %v50_v10, %v672_v0  ;;  %v57_v13 = vstv %s531_s20  ;;  %s537_s24 = sld [smem:[#allocation2 + $0xd]] }
  0x12   :  { %v34_v14 = vadd.f32 %v32_v8, %v27_v3  ;;  %v46_v15 = vrot.slane %v44_v9, 3  ;;  %v58_v16 = vmul.f32 %v57_v13, %v672_v0  ;;  %v64_v17 = vstv %s532_s21  ;;  %s538_s25 = sld [smem:[#allocation2 + $0x13]] }
  0x13   :  { %v71_v18 = vstv %s533_s0  ;;  %s539_s26 = sld [smem:[#allocation2 + $0x19]]  ;;  %v53_v20 = vrot.slane %v51_v12, 4  ;;  %v65_v21 = vmul.f32 %v64_v17, %v672_v0 }
  0x14   :  { %v41_v19 = vadd.f32 %v39_v11, %v34_v14  ;;  %s540_s27 = sld [smem:[#allocation2 + $0x1f]]  ;;  %v72_v22 = vmul.f32 %v71_v18, %v672_v0  ;;  %v60_v25 = vrot.slane %v58_v16, 5  ;;  %v78_v49 = vstv %s676_s22 }
  0x15   :  { %v85_v23 = vstv %s535_s23  ;;  %s541_s28 = sld [smem:[#allocation2 + $0x25]]  ;;  %v67_v31 = vrot.slane %v65_v21, 6 }
  0x16   :  { %v48_v24 = vadd.f32 %v46_v15, %v41_v19  ;;  %v88_v26 = vstv %s536_s1  ;;  %s684_s29 = sld [smem:[#allocation2 + $0x2b]]  ;;  %v86_v27 = vmul.f32 %v85_v23, %v672_v0  ;;  %v74_v34 = vrot.slane %v72_v22, 7 }
  0x17   :  { %v89_v28 = vmul.f32 %v88_v26, %v672_v0  ;;  %v95_v29 = vstv %s537_s24  ;;  %s688_s30 = sld [smem:[#allocation2 + $0x31]] }
  0x18   :  { %v55_v30 = vadd.f32 %v53_v20, %v48_v24  ;;  %v96_v32 = vmul.f32 %v95_v29, %v672_v0  ;;  %v102_v33 = vstv %s538_s25  ;;  %s691_s3 = sld [smem:[#allocation2 + $0x2]] }
  0x19   :  { %v91_v35 = vrot.slane %v89_v28, 1  ;;  %v103_v36 = vmul.f32 %v102_v33, %v672_v0  ;;  %v109_v37 = vstv %s539_s26  ;;  %s545_s4 = sld [smem:[#allocation2 + $0x8]] }
  0x1a   :  { %v62_v38 = vadd.f32 %v60_v25, %v55_v30  ;;  %v98_v39 = vrot.slane %v96_v32, 2  ;;  %v110_v40 = vmul.f32 %v109_v37, %v672_v0  ;;  %v116_v41 = vstv %s540_s27  ;;  %s546_s5 = sld [smem:[#allocation2 + $0xe]] }
  0x1b   :  { %v93_v42 = vadd.f32 %v91_v35, %v86_v27  ;;  %v105_v43 = vrot.slane %v103_v36, 3  ;;  %v117_v44 = vmul.f32 %v116_v41, %v672_v0  ;;  %v123_v45 = vstv %s541_s28  ;;  %s547_s6 = sld [smem:[#allocation2 + $0x14]] }
  0x1c   :  { %v69_v46 = vadd.f32 %v67_v31, %v62_v38  ;;  %v124_v47 = vmul.f32 %v123_v45, %v672_v0  ;;  %v130_v48 = vstv %s684_s29  ;;  %s698_s7 = sld [smem:[#allocation2 + $0x1a]]  ;;  %v112_v51 = vrot.slane %v110_v40, 4 }
  0x1d   :  { %v100_v50 = vadd.f32 %v98_v39, %v93_v42  ;;  %v131_v52 = vmul.f32 %v130_v48, %v672_v0  ;;  %s702_s8 = sld [smem:[#allocation2 + $0x20]]  ;;  %v119_v56 = vrot.slane %v117_v44, 5  ;;  %v137_v18 = vstv %s688_s30 }
  0x1e   :  { %v76_v53 = vadd.f32 %v74_v34, %v69_v46  ;;  %v144_v54 = vstv %s691_s3  ;;  %s705_s9 = sld [smem:[#allocation2 + $0x26]]  ;;  %v126_v57 = vrot.slane %v124_v47, 6 }
  0x1f   :  { %v107_v55 = vadd.f32 %v105_v43, %v100_v50  ;;  %v147_v58 = vstv %s545_s4  ;;  %s707_s10 = sld [smem:[#allocation2 + $0x2c]]  ;;  %v145_v60 = vmul.f32 %v144_v54, %v672_v0  ;;  %v133_v1 = vrot.slane %v131_v52, 7 }
  0x20   :  { %v79_v59 = vadd.f32 %v78_v49, %v76_v53  ;;  %v148_v61 = vmul.f32 %v147_v58, %v672_v0  ;;  %v154_v62 = vstv %s546_s5  ;;  %s711_s11 = sld [smem:[#allocation2 + $0x32]] }
  0x21   :  { %v114_v63 = vadd.f32 %v112_v51, %v107_v55  ;;  %v155_v2 = vmul.f32 %v154_v62, %v672_v0  ;;  %v161_v3 = vstv %s547_s6  ;;  %s714_s12 = sld [smem:[#allocation2 + $0x3]] }
  0x22   :  { %v80_v4 = vmul.f32 0.5, %v79_v59  ;;  %v150_v5 = vrot.slane %v148_v61, 1  ;;  %v162_v6 = vmul.f32 %v161_v3, %v672_v0  ;;  %v168_v7 = vstv %s698_s7  ;;  %s718_s13 = sld [smem:[#allocation2 + $0x9]] }
  0x23   :  { %v121_v8 = vadd.f32 %v119_v56, %v114_v63  ;;  %v157_v9 = vrot.slane %v155_v2, 2  ;;  %v169_v10 = vmul.f32 %v168_v7, %v672_v0  ;;  %v175_v11 = vstv %s702_s8  ;;  %s722_s14 = sld [smem:[#allocation2 + $0xf]] }
  0x24   :  { %614 = vtanh.f32 %v80_v4  ;;  %v152_v12 = vadd.f32 %v150_v5, %v145_v60  ;;  %v164_v13 = vrot.slane %v162_v6, 3  ;;  %v176_v14 = vmul.f32 %v175_v11, %v672_v0  ;;  %s725_s15 = sld [smem:[#allocation2 + $0x15]] }
  0x25   :  { %v128_v15 = vadd.f32 %v126_v57, %v121_v8  ;;  %v182_v16 = vstv %s705_s9  ;;  %v189_v17 = vstv %s707_s10  ;;  %s729_s16 = sld [smem:[#allocation2 + $0x1b]]  ;;  %v171_v20 = vrot.slane %v169_v10, 4 }
  0x26   :  { %v159_v19 = vadd.f32 %v157_v9, %v152_v12  ;;  %v183_v21 = vmul.f32 %v182_v16, %v672_v0  ;;  %s733_s17 = sld [smem:[#allocation2 + $0x21]]  ;;  %v190_v23 = vmul.f32 %v189_v17, %v672_v0  ;;  %v178_v26 = vrot.slane %v176_v14, 5 }
  0x27   :  { %v135_v22 = vadd.f32 %v133_v1, %v128_v15  ;;  %v203_v24 = vstv %s714_s12  ;;  %s737_s18 = sld [smem:[#allocation2 + $0x27]]  ;;  %v196_v51 = vstv %s711_s11 }
  0x28   :  { %v166_v25 = vadd.f32 %v164_v13, %v159_v19  ;;  %v185_v27 = vrot.slane %v183_v21, 6  ;;  %s739_s19 = sld [smem:[#allocation2 + $0x2d]]  ;;  %v204_v29 = vmul.f32 %v203_v24, %v672_v0  ;;  %v206_v30 = vstv %s718_s13 }
  0x29   :  { %v138_v28 = vadd.f32 %v137_v18, %v135_v22  ;;  %v213_v31 = vstv %s722_s14  ;;  %s744_s20 = sld [smem:[#allocation2 + $0x33]]  ;;  %v207_v34 = vmul.f32 %v206_v30, %v672_v0  ;;  %v192_v38 = vrot.slane %v190_v23, 7 }
  0x2a   :  { %v615_v32 = vpop.eup %614  ;;  %v173_v33 = vadd.f32 %v171_v20, %v166_v25  ;;  %v214_v35 = vmul.f32 %v213_v31, %v672_v0  ;;  %v220_v36 = vstv %s725_s15  ;;  %s749_s21 = sld [smem:[#allocation2 + $0x4]] }
  0x2b   :  { %v139_v37 = vmul.f32 0.5, %v138_v28  ;;  %v221_v39 = vmul.f32 %v220_v36, %v672_v0  ;;  %v227_v40 = vstv %s729_s16  ;;  %s753_s0 = sld [smem:[#allocation2 + $0xa]]  ;;  %v209_v42 = vrot.slane %v207_v34, 1 }
  0x2c   :  { %v180_v41 = vadd.f32 %v178_v26, %v173_v33  ;;  %v216_v43 = vrot.slane %v214_v35, 2  ;;  %v228_v44 = vmul.f32 %v227_v40, %v672_v0  ;;  %s756_s22 = sld [smem:[#allocation2 + $0x10]]  ;;  %v82_v45 = vadd.f32 1.0, %v615_v32 }
  0x2d   :  { %616 = vtanh.f32 %v139_v37  ;;  %v234_v46 = vstv %s733_s17  ;;  %s759_s23 = sld [smem:[#allocation2 + $0x16]]  ;;  %v211_v48 = vadd.f32 %v209_v42, %v204_v29  ;;  %v223_v49 = vrot.slane %v221_v39, 3 }
  0x2e   :  { %v187_v47 = vadd.f32 %v185_v27, %v180_v41  ;;  %v235_v50 = vmul.f32 %v234_v46, %v672_v0  ;;  %s762_s1 = sld [smem:[#allocation2 + $0x1c]]  ;;  %v241_v52 = vstv %s737_s18  ;;  %v248_v53 = vstv %s739_s19 }
  0x2f   :  { %s767_s24 = sld [smem:[#allocation2 + $0x22]]  ;;  %v218_v55 = vadd.f32 %v216_v43, %v211_v48  ;;  %v230_v56 = vrot.slane %v228_v44, 4  ;;  %v242_v57 = vmul.f32 %v241_v52, %v672_v0  ;;  %v772_v58 = vmul.f32 0.5, %v82_v45 }
  0x30   :  { %v194_v54 = vadd.f32 %v192_v38, %v187_v47  ;;  %s770_s25 = sld [smem:[#allocation2 + $0x28]]  ;;  %v237_v59 = vrot.slane %v235_v50, 5  ;;  %v262_v60 = vstv %s749_s21  ;;  %v249_v2 = vmul.f32 %v248_v53, %v672_v0 }
  0x31   :  { %v265_v61 = vstv %s753_s0  ;;  %s776_s26 = sld [smem:[#allocation2 + $0x2e]]  ;;  %v225_v63 = vadd.f32 %v223_v49, %v218_v55  ;;  %v244_v1 = vrot.slane %v242_v57, 6  ;;  %v263_v4 = vmul.f32 %v262_v60, %v672_v0 }
  0x32   :  { %v197_v62 = vadd.f32 %v196_v51, %v194_v54  ;;  %s779_s27 = sld [smem:[#allocation2 + $0x34]]  ;;  %v266_v5 = vmul.f32 %v265_v61, %v672_v0  ;;  %v272_v6 = vstv %s756_s22  ;;  %v251_v17 = vrot.slane %v249_v2, 7 }
  0x33   :  { %v617_v3 = vpop.eup %616  ;;  %v279_v7 = vstv %s759_s23  ;;  %s785_s28 = sld [smem:[#allocation2 + $0x5]]  ;;  %v232_v10 = vadd.f32 %v230_v56, %v225_v63  ;;  %v273_v11 = vmul.f32 %v272_v6, %v672_v0  ;;  %v255_v18 = vstv %s744_s20 }
  0x34   :  { %v141_v8 = vadd.f32 1.0, %v617_v3  ;;  %v198_v9 = vmul.f32 0.5, %v197_v62  ;;  %s788_s29 = sld [smem:[#allocation2 + $0xb]]  ;;  %v268_v12 = vrot.slane %v266_v5, 1  ;;  %v280_v13 = vmul.f32 %v279_v7, %v672_v0 }
  0x35   :  { %v286_v14 = vstv %s762_s1  ;;  %v293_v15 = vstv %s767_s24  ;;  %s793_s30 = sld [smem:[#allocation2 + $0x11]]  ;;  %v239_v16 = vadd.f32 %v237_v59, %v232_v10  ;;  %v275_v19 = vrot.slane %v273_v11, 2 }
  0x36   :  { %s796_s3 = sld [smem:[#allocation2 + $0x17]]  ;;  %v270_v20 = vadd.f32 %v268_v12, %v263_v4  ;;  %v282_v21 = vrot.slane %v280_v13, 3  ;;  %v287_v22 = vmul.f32 %v286_v14, %v672_v0  ;;  %v294_v23 = vmul.f32 %v293_v15, %v672_v0 }
  0x37   :  { %s800_s4 = sld [smem:[#allocation2 + $0x1d]]  ;;  %v802_v24 = vmul.f32 0.5, %v141_v8  ;;  %v246_v25 = vadd.f32 %v244_v1, %v239_v16  ;;  %v300_v26 = vstv %s770_s25  ;;  %v307_v27 = vstv %s776_s26 }
  0x38   :  { %s806_s5 = sld [smem:[#allocation2 + $0x23]]  ;;  %618 = vtanh.f32 %v198_v9  ;;  %v277_v28 = vadd.f32 %v275_v19, %v270_v20  ;;  %v289_v29 = vrot.slane %v287_v22, 4  ;;  %v301_v30 = vmul.f32 %v300_v26, %v672_v0 }
  0x39   :  { %s809_s6 = sld [smem:[#allocation2 + $0x29]]  ;;  %v253_v31 = vadd.f32 %v251_v17, %v246_v25  ;;  %v296_v32 = vrot.slane %v294_v23, 5  ;;  %v321_v33 = vstv %s785_s28  ;;  %v308_v36 = vmul.f32 %v307_v27, %v672_v0 }
  0x3a   :  { %v324_v34 = vstv %s788_s29  ;;  %s813_s7 = sld [smem:[#allocation2 + $0x2f]]  ;;  %v284_v35 = vadd.f32 %v282_v21, %v277_v28  ;;  %v322_v37 = vmul.f32 %v321_v33, %v672_v0  ;;  %v314_v40 = vstv %s779_s27 }
  0x3b   :  { %v325_v38 = vmul.f32 %v324_v34, %v672_v0  ;;  %s818_s8 = sld [smem:[#allocation2 + $0x35]]  ;;  %v256_v39 = vadd.f32 %v255_v18, %v253_v31  ;;  %v331_v41 = vstv %s793_s30  ;;  %v303_v44 = vrot.slane %v301_v30, 6 }
  0x3c   :  { %v338_v42 = vstv %s796_s3  ;;  %s823_s9 = sld [smem:[#allocation2 + $0x36]]  ;;  %v291_v43 = vadd.f32 %v289_v29, %v284_v35  ;;  %v332_v46 = vmul.f32 %v331_v41, %v672_v0  ;;  %v310_v53 = vrot.slane %v308_v36, 7 }
  0x3d   :  { %v327_v45 = vrot.slane %v325_v38, 1  ;;  %s826_s10 = sld [smem:[#allocation2 + $0x3a]]  ;;  %v257_v47 = vmul.f32 0.5, %v256_v39  ;;  %v339_v48 = vmul.f32 %v338_v42, %v672_v0  ;;  %v345_v49 = vstv %s800_s4 }
  0x3e   :  { %v352_v50 = vstv %s806_s5  ;;  %s831_s11 = sld [smem:[#allocation2 + $0x3e]]  ;;  %v619_v51 = vpop.eup %618  ;;  %v298_v52 = vadd.f32 %v296_v32, %v291_v43  ;;  %v334_v55 = vrot.slane %v332_v46, 2  ;;  %v346_v57 = vmul.f32 %v345_v49, %v672_v0 }
  0x3f   :  { %v329_v54 = vadd.f32 %v327_v45, %v322_v37  ;;  %s833_s12 = sld [smem:[#allocation2 + $0x42]]  ;;  %620 = vtanh.f32 %v257_v47  ;;  %v341_v56 = vrot.slane %v339_v48, 3  ;;  %v353_v59 = vmul.f32 %v352_v50, %v672_v0 }
  0x40   :  { %s837_s13 = sld [smem:[#allocation2 + $0x46]]  ;;  %v305_v60 = vadd.f32 %v303_v44, %v298_v52  ;;  %v359_v62 = vstv %s809_s6  ;;  %v366_v63 = vstv %s813_s7  ;;  %v200_v1 = vadd.f32 1.0, %v619_v51 }
  0x41   :  { %v336_v61 = vadd.f32 %v334_v55, %v329_v54  ;;  %s841_s14 = sld [smem:[#allocation2 + $0x4a]]  ;;  %v348_v2 = vrot.slane %v346_v57, 4  ;;  %v360_v3 = vmul.f32 %v359_v62, %v672_v0  ;;  %v367_v4 = vmul.f32 %v366_v63, %v672_v0 }
  0x42   :  { %s845_s15 = sld [smem:[#allocation2 + $0x4e]]  ;;  %v312_v5 = vadd.f32 %v310_v53, %v305_v60  ;;  %v355_v7 = vrot.slane %v353_v59, 5  ;;  %v380_v8 = vstv %s823_s9  ;;  %v851_v14 = vmul.f32 0.5, %v200_v1 }
  0x43   :  { %v343_v6 = vadd.f32 %v341_v56, %v336_v61  ;;  %s587_s16 = sld [smem:[#allocation2 + $0x37]]  ;;  %v383_v9 = vstv %s826_s10  ;;  %v362_v12 = vrot.slane %v360_v3, 6  ;;  %v369_v0 = vrot.slane %v367_v4, 7 }
  0x44   :  { %s588_s17 = sld [smem:[#allocation2 + $0x3b]]  ;;  %v315_v10 = vadd.f32 %v314_v40, %v312_v5  ;;  %v381_v15 = vmul.f32 %v380_v8, %v772_v58  ;;  %v384_v18 = vmul.f32 %v383_v9, %v802_v24  ;;  %v387_v19 = vstv %s831_s11 }
  0x45   :  { %v350_v11 = vadd.f32 %v348_v2, %v343_v6  ;;  %s849_s18 = sld [smem:[#allocation2 + $0x3f]]  ;;  %v621_v13 = vpop.eup %620  ;;  %v373_v22 = vstv %s818_s8  ;;  %v388_v23 = vmul.f32 %v387_v19, %v851_v14  ;;  %v391_v32 = vstv %s833_s12 }
  0x46   :  { %s854_s19 = sld [smem:[#allocation2 + $0x43]]  ;;  %v316_v16 = vmul.f32 0.5, %v315_v10  ;;  %v259_v20 = vadd.f32 1.0, %v621_v13  ;;  %v385_v28 = vadd.f32 %v384_v18, %v381_v15  ;;  %v395_v41 = vstv %s837_s13 }
  0x47   :  { %v357_v17 = vadd.f32 %v355_v7, %v350_v11  ;;  %s858_s20 = sld [smem:[#allocation2 + $0x47]]  ;;  %v399_v3 = vstv %s841_s14 }
  0x48   :  { %s860_s21 = sld [smem:[#allocation2 + $0x4b]]  ;;  %622 = vtanh.f32 %v316_v16  ;;  %v868_v31 = vmul.f32 0.5, %v259_v20  ;;  %v389_v40 = vadd.f32 %v388_v23, %v385_v28  ;;  %v403_v19 = vstv %s845_s15 }
  0x49   :  { %v364_v21 = vadd.f32 %v362_v12, %v357_v17  ;;  %s862_s0 = sld [smem:[#allocation2 + $0x4f]]  ;;  %v410_v25 = vstv %s587_s16 }
  0x4a   :  { %v413_v26 = vstv %s588_s17  ;;  %s594_s22 = sld [smem:[#allocation2 + $0x38]]  ;;  %v411_v29 = vmul.f32 %v410_v25, %v772_v58  ;;  %v392_v43 = vmul.f32 %v391_v32, %v868_v31 }
  0x4b   :  { %v371_v27 = vadd.f32 %v369_v0, %v364_v21  ;;  %v414_v30 = vmul.f32 %v413_v26, %v802_v24  ;;  %s595_s23 = sld [smem:[#allocation2 + $0x3c]]  ;;  %v417_v33 = vstv %s849_s18 }
  0x4c   :  { %s596_s1 = sld [smem:[#allocation2 + $0x40]]  ;;  %v418_v36 = vmul.f32 %v417_v33, %v851_v14  ;;  %v421_v37 = vstv %s854_s19  ;;  %v393_v55 = vadd.f32 %v392_v43, %v389_v40 }
  0x4d   :  { %v374_v34 = vadd.f32 %v373_v22, %v371_v27  ;;  %v415_v35 = vadd.f32 %v414_v30, %v411_v29  ;;  %s597_s24 = sld [smem:[#allocation2 + $0x44]]  ;;  %v422_v44 = vmul.f32 %v421_v37, %v868_v31  ;;  %v425_v50 = vstv %s858_s20 }
  0x4e   :  { %s874_s25 = sld [smem:[#allocation2 + $0x48]]  ;;  %v623_v38 = vpop.eup %622  ;;  %v429_v4 = vstv %s860_s21 }
  0x4f   :  { %v375_v39 = vmul.f32 0.5, %v374_v34  ;;  %s877_s26 = sld [smem:[#allocation2 + $0x4c]]  ;;  %v318_v42 = vadd.f32 1.0, %v623_v38  ;;  %v419_v46 = vadd.f32 %v418_v36, %v415_v35  ;;  %v433_v25 = vstv %s862_s0 }
  0x50   :  { %v440_v45 = vstv %s594_s22  ;;  %s881_s27 = sld [smem:[#allocation2 + $0x50]] }
  0x51   :  { %624 = vtanh.f32 %v375_v39  ;;  %v441_v47 = vmul.f32 %v440_v45, %v772_v58  ;;  %v443_v48 = vstv %s595_s23  ;;  %s601_s28 = sld [smem:[#allocation2 + $0x39]]  ;;  %v319_v49 = vmul.f32 0.5, %v318_v42 }
  0x52   :  { %v444_v51 = vmul.f32 %v443_v48, %v802_v24  ;;  %v447_v52 = vstv %s596_s1  ;;  %s602_s29 = sld [smem:[#allocation2 + $0x3d]]  ;;  %v423_v60 = vadd.f32 %v422_v44, %v419_v46 }
  0x53   :  { %v448_v53 = vmul.f32 %v447_v52, %v851_v14  ;;  %v451_v54 = vstv %s597_s24  ;;  %s603_s30 = sld [smem:[#allocation2 + $0x41]]  ;;  %v396_v59 = vmul.f32 %v395_v41, %v319_v49  ;;  %v426_v61 = vmul.f32 %v425_v50, %v319_v49 }
  0x54   :  { %v445_v56 = vadd.f32 %v444_v51, %v441_v47  ;;  %v452_v57 = vmul.f32 %v451_v54, %v868_v31  ;;  %s604_s3 = sld [smem:[#allocation2 + $0x45]]  ;;  %v455_v62 = vstv %s874_s25 }
  0x55   :  { %s889_s4 = sld [smem:[#allocation2 + $0x49]]  ;;  %v456_v1 = vmul.f32 %v455_v62, %v319_v49  ;;  %v459_v5 = vstv %s877_s26  ;;  %v397_v11 = vadd.f32 %v396_v59, %v393_v55  ;;  %v427_v12 = vadd.f32 %v426_v61, %v423_v60 }
  0x56   :  { %v449_v63 = vadd.f32 %v448_v53, %v445_v56  ;;  %s891_s5 = sld [smem:[#allocation2 + $0x4d]]  ;;  %v463_v27 = vstv %s881_s27 }
  0x57   :  { %v625_v2 = vpop.eup %624  ;;  %v470_v6 = vstv %s601_s28  ;;  %s607_s6 = sld [smem:[#allocation2 + $0x51]] }
  0x58   :  { %v377_v7 = vadd.f32 1.0, %v625_v2  ;;  %v453_v8 = vadd.f32 %v452_v57, %v449_v63  ;;  %v471_v9 = vmul.f32 %v470_v6, %v772_v58  ;;  %v473_v10 = vstv %s602_s29  ;;  %s608_s7 = sld [smem:[#allocation2 + $0x52]] }
  0x59   :  { %v474_v13 = vmul.f32 %v473_v10, %v802_v24  ;;  %v477_v0 = vstv %s603_s30  ;;  %s609_s8 = sld [smem:[#allocation2 + $0x53]] }
  0x5a   :  { %v378_v15 = vmul.f32 0.5, %v377_v7  ;;  %v457_v16 = vadd.f32 %v456_v1, %v453_v8  ;;  %v478_v17 = vmul.f32 %v477_v0, %v851_v14  ;;  %v481_v18 = vstv %s604_s3  ;;  %s610_s9 = sld [smem:[#allocation2 + $0x54]] }
  0x5b   :  { %v475_v20 = vadd.f32 %v474_v13, %v471_v9  ;;  %v482_v21 = vmul.f32 %v481_v18, %v868_v31  ;;  %v485_v58 = vstv %s889_s4  ;;  %s611_s10 = sld [smem:[#allocation2 + $0x55]] }
  0x5c   :  { %v400_v22 = vmul.f32 %v399_v3, %v378_v15  ;;  %v430_v23 = vmul.f32 %v429_v4, %v378_v15  ;;  %v460_v26 = vmul.f32 %v459_v5, %v378_v15  ;;  %v486_v24 = vmul.f32 %v485_v58, %v319_v49  ;;  %s612_s11 = sld [smem:[#allocation2 + $0x56]] }
  0x5d   :  { %v479_v28 = vadd.f32 %v478_v17, %v475_v20  ;;  %v489_v29 = vstv %s891_s5  ;;  %v493_v41 = vstv %s607_s6 }
  0x5e   :  { %v401_v30 = vadd.f32 %v400_v22, %v397_v11  ;;  %v431_v32 = vadd.f32 %v430_v23, %v427_v12  ;;  %v461_v33 = vadd.f32 %v460_v26, %v457_v16  ;;  %v490_v14 = vmul.f32 %v489_v29, %v378_v15 }
  0x5f   :  { %v483_v34 = vadd.f32 %v482_v21, %v479_v28  ;;  %v500_v50 = vstv %s608_s7  ;;  %v503_v53 = vstv %s609_s8 }
  0x60   :  { %v404_v35 = vadd.f32 %v403_v19, %v401_v30  ;;  %v434_v36 = vadd.f32 %v433_v25, %v431_v32  ;;  %v464_v37 = vadd.f32 %v463_v27, %v461_v33  ;;  %v507_v55 = vstv %s610_s9 }
  0x61   :  { %v487_v38 = vadd.f32 %v486_v24, %v483_v34  ;;  %v511_v63 = vstv %s611_s10 }
  0x62   :  { %v405_v39 = vmul.f32 0.5, %v404_v35  ;;  %v435_v31 = vmul.f32 0.5, %v434_v36  ;;  %v465_v40 = vmul.f32 0.5, %v464_v37  ;;  %v515_v5 = vstv %s612_s11 }
  0x63   :  { %v491_v42 = vadd.f32 %v490_v14, %v487_v38 }
  0x64   :  { %626 = vtanh.f32 %v405_v39 }
  0x65   :  { %628 = vtanh.f32 %v435_v31  ;;  %v494_v43 = vadd.f32 %v493_v41, %v491_v42 }
  0x66   :  { %630 = vtanh.f32 %v465_v40 }
  0x67   :  { %v495_v44 = vmul.f32 0.5, %v494_v43 }
  0x69   :  { %632 = vtanh.f32 %v495_v44 }
  0x6a   :  { %v627_v45 = vpop.eup %626 }
  0x6b   :  { %v629_v46 = vpop.eup %628  ;;  %v407_v47 = vadd.f32 1.0, %v627_v45 }
  0x6c   :  { %v631_v48 = vpop.eup %630  ;;  %v437_v49 = vadd.f32 1.0, %v629_v46 }
  0x6d   :  { %v408_v51 = vmul.f32 0.5, %v407_v47  ;;  %v467_v52 = vadd.f32 1.0, %v631_v48 }
  0x6e   :  { %v438_v54 = vmul.f32 0.5, %v437_v49 }
  0x6f   :  { %v633_v56 = vpop.eup %632  ;;  %v468_v57 = vmul.f32 0.5, %v467_v52  ;;  %v501_v59 = vmul.f32 %v500_v50, %v408_v51 }
  0x70   :  { %v497_v60 = vadd.f32 1.0, %v633_v56  ;;  %v504_v61 = vmul.f32 %v503_v53, %v438_v54 }
  0x71   :  { %v508_v62 = vmul.f32 %v507_v55, %v468_v57 }
  0x72   :  { %v498_v1 = vmul.f32 0.5, %v497_v60  ;;  %v505_v2 = vadd.f32 %v504_v61, %v501_v59 }
  0x74   :  { %v509_v3 = vadd.f32 %v508_v62, %v505_v2  ;;  %v512_v4 = vmul.f32 %v511_v63, %v498_v1 }
  0x76   :  { %v513_v6 = vadd.f32 %v512_v4, %v509_v3 }
  0x78   :  { %v516_v7 = vadd.f32 %v515_v5, %v513_v6 }
  0x7a   :  { %v517_v8 = vmul.f32 0.5, %v516_v7 }
  0x7c   :  { %634 = vtanh.f32 %v517_v8 }
  0x82   :  { %v635_v9 = vpop.eup %634 }
  0x83   :  { %v519_v10 = vadd.f32 1.0, %v635_v9 }
  0x85   :  { %v520_v11 = vmul.f32 0.5, %v519_v10 }
  0x87   :  { %521 = vst [vmem:[%s910_s2] sm:$0x1] %v520_v11 }
  0x88   :  { %526 = vsyncpa [#allocation3], 1 }

</bundles_post_ra>
